<compile_context>
chip_gen: v5e
topology: v5e:2x2
jax: 0.10.0
libtpu: 0.0.40
codegen_flags: <defaults>
</compile_context>

<pallas_src>
import functools

import jax
import jax.numpy as jnp
from jax import lax
from jax.experimental import pallas as pl
from jax.experimental.pallas import tpu as pltpu


def basic_block_kernel(x_ref, w1_ref, w2_ref, s1_ref, b1_ref, s2_ref, b2_ref,
                       o_ref, *, H, W):
    # x_ref : (1, C, H*W)      one batch element, pixels on lanes
    # w1_ref: (Cout, 9*Cin)    flattened 3x3 conv1 weights (tap-major)
    # w2_ref: (Cout, 9*Cout)   flattened 3x3 conv2 weights (tap-major)
    # s*/b* : (Cout, 1)        folded BN scale / bias
    # o_ref : (1, Cout, H*W)
    C = x_ref.shape[1]
    HW = H * W

    x = x_ref[0]  # (C, HW) float32

    # Pixel coordinate helpers (computed once, shared by both convs).
    lane = lax.broadcasted_iota(jnp.int32, (C, HW), 1)  # flat pixel index
    col = lane % W                                      # column within a row

    # Per-tap in-bounds masks for the 3x3 stencil (None == center tap, all
    # valid). Expressed with lane-range / column tests only (no division).
    tap_offsets = []
    tap_masks = []
    for dh in (-1, 0, 1):
        for dw in (-1, 0, 1):
            tap_offsets.append(dh * W + dw)
            conds = []
            if dh == -1:
                conds.append(lane >= W)                 # has a row above
            elif dh == 1:
                conds.append(lane < (H - 1) * W)        # has a row below
            if dw == -1:
                conds.append(col >= 1)                  # has a column left
            elif dw == 1:
                conds.append(col <= W - 2)              # has a column right
            if conds:
                m = conds[0]
                for c in conds[1:]:
                    m = m & c
                tap_masks.append(m)
            else:
                tap_masks.append(None)

    def im2col(act):
        # act: (C, HW) -> (9*C, HW); the 9 shifted taps are lane rolls
        # (XLU, cheap) masked at the image border.
        taps = []
        for off, mask in zip(tap_offsets, tap_masks):
            if off == 0:
                rolled = act
            else:
                rolled = pltpu.roll(act, shift=(-off) % HW, axis=1)
            taps.append(rolled if mask is None else jnp.where(mask, rolled, 0.0))
        return jnp.concatenate(taps, axis=0)

    # conv1 (single fused K=9*Cin matmul) + bn1 + relu.
    y1 = jnp.dot(w1_ref[...], im2col(x), preferred_element_type=jnp.float32)
    y1 = jnp.maximum(y1 * s1_ref[...] + b1_ref[...], 0.0)

    # conv2 (single fused K=9*Cout matmul) + bn2 + residual add + relu.
    y2 = jnp.dot(w2_ref[...], im2col(y1), preferred_element_type=jnp.float32)
    y2 = y2 * s2_ref[...] + b2_ref[...]
    o_ref[0] = jnp.maximum(y2 + x, 0.0).astype(o_ref.dtype)


@jax.jit
def basic_block_forward(x_nchw, w1_hwio, w2_hwio, s1, b1, s2, b2):
    """x_nchw: (N, C, H, W) float32. Returns (N, C, H, W)."""
    N, C, H, W = x_nchw.shape
    Cout = w1_hwio.shape[-1]
    # Residual path adds the raw input: requires inplanes == planes, stride=1
    # (i.e. downsample=None), exactly as in the reference BasicBlock usage.
    assert C == Cout, "BasicBlock kernel requires inplanes == planes"
    HW = H * W

    # NCHW -> (N, C, H*W) is a free reshape (same memory layout).
    x_flat = x_nchw.reshape(N, C, HW)

    # Flatten 3x3 HWIO weights to (Cout, 9*Cin), tap-major / channel-minor,
    # matching the im2col row order built inside the kernel.
    w1f = jnp.transpose(w1_hwio.reshape(9, C, Cout), (2, 0, 1)).reshape(Cout, 9 * C)
    w2f = jnp.transpose(w2_hwio.reshape(9, Cout, Cout), (2, 0, 1)).reshape(Cout, 9 * Cout)

    s1_ = s1.reshape(Cout, 1)
    b1_ = b1.reshape(Cout, 1)
    s2_ = s2.reshape(Cout, 1)
    b2_ = b2.reshape(Cout, 1)

    kernel = functools.partial(basic_block_kernel, H=H, W=W)

    out_flat = pl.pallas_call(
        kernel,
        out_shape=jax.ShapeDtypeStruct((N, Cout, HW), jnp.float32),
        grid_spec=pltpu.PrefetchScalarGridSpec(
            num_scalar_prefetch=0,
            grid=(N,),
            in_specs=[
                pl.BlockSpec((1, C, HW), lambda n: (n, 0, 0)),
                pl.BlockSpec((Cout, 9 * C), lambda n: (0, 0)),
                pl.BlockSpec((Cout, 9 * Cout), lambda n: (0, 0)),
                pl.BlockSpec((Cout, 1), lambda n: (0, 0)),
                pl.BlockSpec((Cout, 1), lambda n: (0, 0)),
                pl.BlockSpec((Cout, 1), lambda n: (0, 0)),
                pl.BlockSpec((Cout, 1), lambda n: (0, 0)),
            ],
            out_specs=pl.BlockSpec((1, Cout, HW), lambda n: (n, 0, 0)),
        ),
        compiler_params=pltpu.CompilerParams(
            dimension_semantics=("parallel",)),
    )(x_flat, w1f, w2f, s1_, b1_, s2_, b2_)

    # (N, Cout, H*W) -> NCHW is again a free reshape.
    return out_flat.reshape(N, Cout, H, W)


def reference_forward(x_nchw, w1_hwio, w2_hwio, s1, b1, s2, b2):
    """Pure-JAX reference (same math) for correctness checking."""
    dn = ('NCHW', 'HWIO', 'NCHW')
    s1b = s1.reshape(1, -1, 1, 1)
    b1b = b1.reshape(1, -1, 1, 1)
    s2b = s2.reshape(1, -1, 1, 1)
    b2b = b2.reshape(1, -1, 1, 1)
    o = lax.conv_general_dilated(x_nchw, w1_hwio, (1, 1), 'SAME',
                                 dimension_numbers=dn)
    o = jnp.maximum(o * s1b + b1b, 0.0)
    o = lax.conv_general_dilated(o, w2_hwio, (1, 1), 'SAME',
                                 dimension_numbers=dn)
    o = o * s2b + b2b
    return jnp.maximum(o + x_nchw, 0.0)


if __name__ == "__main__":
    # Small shapes consistent with BasicBlock(inplanes=4, planes=4, stride=1).
    N, C, H, W = 2, 4, 16, 16
    eps = 1e-5

    key = jax.random.PRNGKey(0)
    ks = jax.random.split(key, 10)

    x = jax.random.normal(ks[0], (N, C, H, W), jnp.float32)

    # Conv weights (PyTorch OIHW -> HWIO for the kernel/reference).
    w1_oihw = 0.1 * jax.random.normal(ks[1], (C, C, 3, 3), jnp.float32)
    w2_oihw = 0.1 * jax.random.normal(ks[2], (C, C, 3, 3), jnp.float32)
    w1_hwio = jnp.transpose(w1_oihw, (2, 3, 1, 0))
    w2_hwio = jnp.transpose(w2_oihw, (2, 3, 1, 0))

    # BatchNorm params (synthetic), folded to scale/bias.
    gamma1 = 1.0 + 0.1 * jax.random.normal(ks[3], (C,), jnp.float32)
    beta1 = 0.1 * jax.random.normal(ks[4], (C,), jnp.float32)
    mean1 = 0.1 * jax.random.normal(ks[5], (C,), jnp.float32)
    var1 = jnp.abs(jax.random.normal(ks[6], (C,), jnp.float32)) + 0.5

    gamma2 = 1.0 + 0.1 * jax.random.normal(ks[7], (C,), jnp.float32)
    beta2 = 0.1 * jax.random.normal(ks[8], (C,), jnp.float32)
    mean2 = 0.1 * jax.random.normal(ks[9], (C,), jnp.float32)
    var2 = jnp.abs(jax.random.normal(ks[6], (C,), jnp.float32)) + 0.7

    s1 = gamma1 / jnp.sqrt(var1 + eps)
    b1 = beta1 - mean1 * s1
    s2 = gamma2 / jnp.sqrt(var2 + eps)
    b2 = beta2 - mean2 * s2

    out = basic_block_forward(x, w1_hwio, w2_hwio, s1, b1, s2, b2)
    out = jax.block_until_ready(out)

    ref = reference_forward(x, w1_hwio, w2_hwio, s1, b1, s2, b2)
    assert out.shape == (N, C, H, W)
    assert jnp.allclose(out, ref, rtol=1e-4, atol=1e-4), "mismatch vs reference"

    print("KERNEL_OK")
</pallas_src>

<mosaic_0001>
module attributes {stable_mosaic.version = 11 : i64} {
  func.func @basic_block_kernel(%arg0: i32, %arg1: memref<1x4x256xf32, #tpu.memory_space<vmem>>, %arg2: memref<4x36xf32, #tpu.memory_space<vmem>>, %arg3: memref<4x36xf32, #tpu.memory_space<vmem>>, %arg4: memref<4x1xf32, #tpu.memory_space<vmem>>, %arg5: memref<4x1xf32, #tpu.memory_space<vmem>>, %arg6: memref<4x1xf32, #tpu.memory_space<vmem>>, %arg7: memref<4x1xf32, #tpu.memory_space<vmem>>, %arg8: memref<1x4x256xf32, #tpu.memory_space<vmem>>) attributes {dimension_semantics = [#tpu.dimension_semantics<parallel>], iteration_bounds = array<i64: 2>, scalar_prefetch = 0 : i64, scratch_operands = 0 : i64, tpu.core_type = #tpu.core_type<tc>, window_params = [{transform_indices = @transform_0, window_bounds = array<i64: 1, 4, 256>}, {pipeline_mode = #tpu.pipeline_mode<synchronous>, transform_indices = @transform_1, window_bounds = array<i64: 4, 36>}, {pipeline_mode = #tpu.pipeline_mode<synchronous>, transform_indices = @transform_2, window_bounds = array<i64: 4, 36>}, {pipeline_mode = #tpu.pipeline_mode<synchronous>, transform_indices = @transform_3, window_bounds = array<i64: 4, 1>}, {pipeline_mode = #tpu.pipeline_mode<synchronous>, transform_indices = @transform_4, window_bounds = array<i64: 4, 1>}, {pipeline_mode = #tpu.pipeline_mode<synchronous>, transform_indices = @transform_5, window_bounds = array<i64: 4, 1>}, {pipeline_mode = #tpu.pipeline_mode<synchronous>, transform_indices = @transform_6, window_bounds = array<i64: 4, 1>}, {transform_indices = @transform_7, window_bounds = array<i64: 1, 4, 256>}]} {
    %c0 = arith.constant 0 : index
    %c0_0 = arith.constant 0 : index
    %c0_1 = arith.constant 0 : index
    %0 = vector.load %arg1[%c0, %c0_0, %c0_1] : memref<1x4x256xf32, #tpu.memory_space<vmem>>, vector<1x4x256xf32>
    %1 = vector.shape_cast %0 : vector<1x4x256xf32> to vector<4x256xf32>
    %2 = tpu.iota {dimensions = array<i32: 1>} : vector<4x256xi32>
    %c16_i32 = arith.constant 16 : i32
    %c0_i32 = arith.constant 0 : i32
    %3 = arith.cmpi eq, %c16_i32, %c0_i32 : i32
    %c1_i32 = arith.constant 1 : i32
    %4 = arith.select %3, %c1_i32, %c16_i32 : i32
    %5 = vector.broadcast %4 : i32 to vector<4x256xi32>
    %6 = arith.remsi %2, %5 : vector<4x256xi32>
    %c0_i32_2 = arith.constant 0 : i32
    %7 = vector.broadcast %c0_i32_2 : i32 to vector<4x256xi32>
    %8 = arith.cmpi ne, %6, %7 : vector<4x256xi32>
    %c0_i32_3 = arith.constant 0 : i32
    %9 = vector.broadcast %c0_i32_3 : i32 to vector<4x256xi32>
    %10 = arith.cmpi slt, %6, %9 : vector<4x256xi32>
    %c0_i32_4 = arith.constant 0 : i32
    %11 = arith.cmpi slt, %4, %c0_i32_4 : i32
    %12 = vector.broadcast %11 : i1 to vector<4x256xi1>
    %13 = vector.broadcast %12 : vector<4x256xi1> to vector<4x256xi1>
    %14 = arith.xori %10, %13 : vector<4x256xi1>
    %15 = arith.andi %14, %8 : vector<4x256xi1>
    %16 = vector.broadcast %4 : i32 to vector<4x256xi32>
    %17 = arith.addi %6, %16 : vector<4x256xi32>
    %18 = arith.select %15, %17, %6 : vector<4x256xi1>, vector<4x256xi32>
    %c16_i32_5 = arith.constant 16 : i32
    %19 = vector.broadcast %c16_i32_5 : i32 to vector<4x256xi32>
    %20 = arith.cmpi sge, %2, %19 : vector<4x256xi32>
    %c1_i32_6 = arith.constant 1 : i32
    %21 = vector.broadcast %c1_i32_6 : i32 to vector<4x256xi32>
    %22 = arith.cmpi sge, %18, %21 : vector<4x256xi32>
    %23 = arith.andi %20, %22 : vector<4x256xi1>
    %c16_i32_7 = arith.constant 16 : i32
    %24 = vector.broadcast %c16_i32_7 : i32 to vector<4x256xi32>
    %25 = arith.cmpi sge, %2, %24 : vector<4x256xi32>
    %c16_i32_8 = arith.constant 16 : i32
    %26 = vector.broadcast %c16_i32_8 : i32 to vector<4x256xi32>
    %27 = arith.cmpi sge, %2, %26 : vector<4x256xi32>
    %c14_i32 = arith.constant 14 : i32
    %28 = vector.broadcast %c14_i32 : i32 to vector<4x256xi32>
    %29 = arith.cmpi sle, %18, %28 : vector<4x256xi32>
    %30 = arith.andi %27, %29 : vector<4x256xi1>
    %c1_i32_9 = arith.constant 1 : i32
    %31 = vector.broadcast %c1_i32_9 : i32 to vector<4x256xi32>
    %32 = arith.cmpi sge, %18, %31 : vector<4x256xi32>
    %c14_i32_10 = arith.constant 14 : i32
    %33 = vector.broadcast %c14_i32_10 : i32 to vector<4x256xi32>
    %34 = arith.cmpi sle, %18, %33 : vector<4x256xi32>
    %c240_i32 = arith.constant 240 : i32
    %35 = vector.broadcast %c240_i32 : i32 to vector<4x256xi32>
    %36 = arith.cmpi slt, %2, %35 : vector<4x256xi32>
    %c1_i32_11 = arith.constant 1 : i32
    %37 = vector.broadcast %c1_i32_11 : i32 to vector<4x256xi32>
    %38 = arith.cmpi sge, %18, %37 : vector<4x256xi32>
    %39 = arith.andi %36, %38 : vector<4x256xi1>
    %c240_i32_12 = arith.constant 240 : i32
    %40 = vector.broadcast %c240_i32_12 : i32 to vector<4x256xi32>
    %41 = arith.cmpi slt, %2, %40 : vector<4x256xi32>
    %c240_i32_13 = arith.constant 240 : i32
    %42 = vector.broadcast %c240_i32_13 : i32 to vector<4x256xi32>
    %43 = arith.cmpi slt, %2, %42 : vector<4x256xi32>
    %c14_i32_14 = arith.constant 14 : i32
    %44 = vector.broadcast %c14_i32_14 : i32 to vector<4x256xi32>
    %45 = arith.cmpi sle, %18, %44 : vector<4x256xi32>
    %46 = arith.andi %43, %45 : vector<4x256xi1>
    %c0_15 = arith.constant 0 : index
    %c0_16 = arith.constant 0 : index
    %47 = vector.load %arg2[%c0_15, %c0_16] : memref<4x36xf32, #tpu.memory_space<vmem>>, vector<4x36xf32>
    %c17_i32 = arith.constant 17 : i32
    %48 = tpu.dynamic_rotate %1 by %c17_i32 dim 1 : vector<4x256xf32>, i32 -> vector<4x256xf32>
    %cst = arith.constant 0.000000e+00 : f32
    %49 = vector.broadcast %cst : f32 to vector<4x256xf32>
    %50 = arith.select %23, %48, %49 : vector<4x256xi1>, vector<4x256xf32>
    %c16_i32_17 = arith.constant 16 : i32
    %51 = tpu.dynamic_rotate %1 by %c16_i32_17 dim 1 : vector<4x256xf32>, i32 -> vector<4x256xf32>
    %cst_18 = arith.constant 0.000000e+00 : f32
    %52 = vector.broadcast %cst_18 : f32 to vector<4x256xf32>
    %53 = arith.select %25, %51, %52 : vector<4x256xi1>, vector<4x256xf32>
    %c15_i32 = arith.constant 15 : i32
    %54 = tpu.dynamic_rotate %1 by %c15_i32 dim 1 : vector<4x256xf32>, i32 -> vector<4x256xf32>
    %cst_19 = arith.constant 0.000000e+00 : f32
    %55 = vector.broadcast %cst_19 : f32 to vector<4x256xf32>
    %56 = arith.select %30, %54, %55 : vector<4x256xi1>, vector<4x256xf32>
    %c1_i32_20 = arith.constant 1 : i32
    %57 = tpu.dynamic_rotate %1 by %c1_i32_20 dim 1 : vector<4x256xf32>, i32 -> vector<4x256xf32>
    %cst_21 = arith.constant 0.000000e+00 : f32
    %58 = vector.broadcast %cst_21 : f32 to vector<4x256xf32>
    %59 = arith.select %32, %57, %58 : vector<4x256xi1>, vector<4x256xf32>
    %c255_i32 = arith.constant 255 : i32
    %60 = tpu.dynamic_rotate %1 by %c255_i32 dim 1 : vector<4x256xf32>, i32 -> vector<4x256xf32>
    %cst_22 = arith.constant 0.000000e+00 : f32
    %61 = vector.broadcast %cst_22 : f32 to vector<4x256xf32>
    %62 = arith.select %34, %60, %61 : vector<4x256xi1>, vector<4x256xf32>
    %c241_i32 = arith.constant 241 : i32
    %63 = tpu.dynamic_rotate %1 by %c241_i32 dim 1 : vector<4x256xf32>, i32 -> vector<4x256xf32>
    %cst_23 = arith.constant 0.000000e+00 : f32
    %64 = vector.broadcast %cst_23 : f32 to vector<4x256xf32>
    %65 = arith.select %39, %63, %64 : vector<4x256xi1>, vector<4x256xf32>
    %c240_i32_24 = arith.constant 240 : i32
    %66 = tpu.dynamic_rotate %1 by %c240_i32_24 dim 1 : vector<4x256xf32>, i32 -> vector<4x256xf32>
    %cst_25 = arith.constant 0.000000e+00 : f32
    %67 = vector.broadcast %cst_25 : f32 to vector<4x256xf32>
    %68 = arith.select %41, %66, %67 : vector<4x256xi1>, vector<4x256xf32>
    %c239_i32 = arith.constant 239 : i32
    %69 = tpu.dynamic_rotate %1 by %c239_i32 dim 1 : vector<4x256xf32>, i32 -> vector<4x256xf32>
    %cst_26 = arith.constant 0.000000e+00 : f32
    %70 = vector.broadcast %cst_26 : f32 to vector<4x256xf32>
    %71 = arith.select %46, %69, %70 : vector<4x256xi1>, vector<4x256xf32>
    %72 = tpu.concatenate %50, %53, %56, %59, %1, %62, %65, %68, %71 in 0 : vector<4x256xf32>, vector<4x256xf32>, vector<4x256xf32>, vector<4x256xf32>, vector<4x256xf32>, vector<4x256xf32>, vector<4x256xf32>, vector<4x256xf32>, vector<4x256xf32> -> vector<36x256xf32>
    %cst_27 = arith.constant dense<0.000000e+00> : vector<4x256xf32>
    %73 = tpu.matmul %47, %72, %cst_27 {dimension_numbers = #tpu.dot_dimension_numbers<[1], [0], [0], [1], [0, 0, 1, 1], [], []>} : vector<4x36xf32>, vector<36x256xf32>, vector<4x256xf32> -> vector<4x256xf32>
    %c0_28 = arith.constant 0 : index
    %c0_29 = arith.constant 0 : index
    %74 = vector.load %arg4[%c0_28, %c0_29] : memref<4x1xf32, #tpu.memory_space<vmem>>, vector<4x1xf32>
    %75 = vector.broadcast %74 : vector<4x1xf32> to vector<4x256xf32>
    %76 = arith.mulf %73, %75 : vector<4x256xf32>
    %c0_30 = arith.constant 0 : index
    %c0_31 = arith.constant 0 : index
    %77 = vector.load %arg5[%c0_30, %c0_31] : memref<4x1xf32, #tpu.memory_space<vmem>>, vector<4x1xf32>
    %78 = vector.broadcast %77 : vector<4x1xf32> to vector<4x256xf32>
    %79 = arith.addf %76, %78 : vector<4x256xf32>
    %cst_32 = arith.constant 0.000000e+00 : f32
    %80 = vector.broadcast %cst_32 : f32 to vector<4x256xf32>
    %81 = arith.maximumf %79, %80 : vector<4x256xf32>
    %c0_33 = arith.constant 0 : index
    %c0_34 = arith.constant 0 : index
    %82 = vector.load %arg3[%c0_33, %c0_34] : memref<4x36xf32, #tpu.memory_space<vmem>>, vector<4x36xf32>
    %c17_i32_35 = arith.constant 17 : i32
    %83 = tpu.dynamic_rotate %81 by %c17_i32_35 dim 1 : vector<4x256xf32>, i32 -> vector<4x256xf32>
    %cst_36 = arith.constant 0.000000e+00 : f32
    %84 = vector.broadcast %cst_36 : f32 to vector<4x256xf32>
    %85 = arith.select %23, %83, %84 : vector<4x256xi1>, vector<4x256xf32>
    %c16_i32_37 = arith.constant 16 : i32
    %86 = tpu.dynamic_rotate %81 by %c16_i32_37 dim 1 : vector<4x256xf32>, i32 -> vector<4x256xf32>
    %cst_38 = arith.constant 0.000000e+00 : f32
    %87 = vector.broadcast %cst_38 : f32 to vector<4x256xf32>
    %88 = arith.select %25, %86, %87 : vector<4x256xi1>, vector<4x256xf32>
    %c15_i32_39 = arith.constant 15 : i32
    %89 = tpu.dynamic_rotate %81 by %c15_i32_39 dim 1 : vector<4x256xf32>, i32 -> vector<4x256xf32>
    %cst_40 = arith.constant 0.000000e+00 : f32
    %90 = vector.broadcast %cst_40 : f32 to vector<4x256xf32>
    %91 = arith.select %30, %89, %90 : vector<4x256xi1>, vector<4x256xf32>
    %c1_i32_41 = arith.constant 1 : i32
    %92 = tpu.dynamic_rotate %81 by %c1_i32_41 dim 1 : vector<4x256xf32>, i32 -> vector<4x256xf32>
    %cst_42 = arith.constant 0.000000e+00 : f32
    %93 = vector.broadcast %cst_42 : f32 to vector<4x256xf32>
    %94 = arith.select %32, %92, %93 : vector<4x256xi1>, vector<4x256xf32>
    %c255_i32_43 = arith.constant 255 : i32
    %95 = tpu.dynamic_rotate %81 by %c255_i32_43 dim 1 : vector<4x256xf32>, i32 -> vector<4x256xf32>
    %cst_44 = arith.constant 0.000000e+00 : f32
    %96 = vector.broadcast %cst_44 : f32 to vector<4x256xf32>
    %97 = arith.select %34, %95, %96 : vector<4x256xi1>, vector<4x256xf32>
    %c241_i32_45 = arith.constant 241 : i32
    %98 = tpu.dynamic_rotate %81 by %c241_i32_45 dim 1 : vector<4x256xf32>, i32 -> vector<4x256xf32>
    %cst_46 = arith.constant 0.000000e+00 : f32
    %99 = vector.broadcast %cst_46 : f32 to vector<4x256xf32>
    %100 = arith.select %39, %98, %99 : vector<4x256xi1>, vector<4x256xf32>
    %c240_i32_47 = arith.constant 240 : i32
    %101 = tpu.dynamic_rotate %81 by %c240_i32_47 dim 1 : vector<4x256xf32>, i32 -> vector<4x256xf32>
    %cst_48 = arith.constant 0.000000e+00 : f32
    %102 = vector.broadcast %cst_48 : f32 to vector<4x256xf32>
    %103 = arith.select %41, %101, %102 : vector<4x256xi1>, vector<4x256xf32>
    %c239_i32_49 = arith.constant 239 : i32
    %104 = tpu.dynamic_rotate %81 by %c239_i32_49 dim 1 : vector<4x256xf32>, i32 -> vector<4x256xf32>
    %cst_50 = arith.constant 0.000000e+00 : f32
    %105 = vector.broadcast %cst_50 : f32 to vector<4x256xf32>
    %106 = arith.select %46, %104, %105 : vector<4x256xi1>, vector<4x256xf32>
    %107 = tpu.concatenate %85, %88, %91, %94, %81, %97, %100, %103, %106 in 0 : vector<4x256xf32>, vector<4x256xf32>, vector<4x256xf32>, vector<4x256xf32>, vector<4x256xf32>, vector<4x256xf32>, vector<4x256xf32>, vector<4x256xf32>, vector<4x256xf32> -> vector<36x256xf32>
    %cst_51 = arith.constant dense<0.000000e+00> : vector<4x256xf32>
    %108 = tpu.matmul %82, %107, %cst_51 {dimension_numbers = #tpu.dot_dimension_numbers<[1], [0], [0], [1], [0, 0, 1, 1], [], []>} : vector<4x36xf32>, vector<36x256xf32>, vector<4x256xf32> -> vector<4x256xf32>
    %c0_52 = arith.constant 0 : index
    %c0_53 = arith.constant 0 : index
    %109 = vector.load %arg6[%c0_52, %c0_53] : memref<4x1xf32, #tpu.memory_space<vmem>>, vector<4x1xf32>
    %110 = vector.broadcast %109 : vector<4x1xf32> to vector<4x256xf32>
    %111 = arith.mulf %108, %110 : vector<4x256xf32>
    %c0_54 = arith.constant 0 : index
    %c0_55 = arith.constant 0 : index
    %112 = vector.load %arg7[%c0_54, %c0_55] : memref<4x1xf32, #tpu.memory_space<vmem>>, vector<4x1xf32>
    %113 = vector.broadcast %112 : vector<4x1xf32> to vector<4x256xf32>
    %114 = arith.addf %111, %113 : vector<4x256xf32>
    %115 = arith.addf %114, %1 : vector<4x256xf32>
    %cst_56 = arith.constant 0.000000e+00 : f32
    %116 = vector.broadcast %cst_56 : f32 to vector<4x256xf32>
    %117 = arith.maximumf %115, %116 : vector<4x256xf32>
    %c0_57 = arith.constant 0 : index
    %c0_58 = arith.constant 0 : index
    %c0_59 = arith.constant 0 : index
    %118 = vector.load %arg8[%c0_57, %c0_58, %c0_59] : memref<1x4x256xf32, #tpu.memory_space<vmem>>, vector<1x4x256xf32>
    %119 = vector.shape_cast %118 : vector<1x4x256xf32> to vector<4x256xf32>
    %120 = vector.shape_cast %117 : vector<4x256xf32> to vector<1x4x256xf32>
    tpu.vector_store %arg8[%c0_57, %c0_58, %c0_59], %120 {strides = array<i32>} : memref<1x4x256xf32, #tpu.memory_space<vmem>>, vector<1x4x256xf32>,
    return
  }
  func.func @transform_0(%arg0: i32) -> (i32, i32, i32) {
    %c0_i32 = arith.constant 0 : i32
    %c0_i32_0 = arith.constant 0 : i32
    %c0_i32_1 = arith.constant 0 : i32
    return %arg0, %c0_i32, %c0_i32_0 : i32, i32, i32
  }
  func.func @transform_1(%arg0: i32) -> (i32, i32) {
    %c0_i32 = arith.constant 0 : i32
    %c0_i32_0 = arith.constant 0 : i32
    %c0_i32_1 = arith.constant 0 : i32
    return %c0_i32, %c0_i32_0 : i32, i32
  }
  func.func @transform_2(%arg0: i32) -> (i32, i32) {
    %c0_i32 = arith.constant 0 : i32
    %c0_i32_0 = arith.constant 0 : i32
    %c0_i32_1 = arith.constant 0 : i32
    return %c0_i32, %c0_i32_0 : i32, i32
  }
  func.func @transform_3(%arg0: i32) -> (i32, i32) {
    %c0_i32 = arith.constant 0 : i32
    %c0_i32_0 = arith.constant 0 : i32
    %c0_i32_1 = arith.constant 0 : i32
    return %c0_i32, %c0_i32_0 : i32, i32
  }
  func.func @transform_4(%arg0: i32) -> (i32, i32) {
    %c0_i32 = arith.constant 0 : i32
    %c0_i32_0 = arith.constant 0 : i32
    %c0_i32_1 = arith.constant 0 : i32
    return %c0_i32, %c0_i32_0 : i32, i32
  }
  func.func @transform_5(%arg0: i32) -> (i32, i32) {
    %c0_i32 = arith.constant 0 : i32
    %c0_i32_0 = arith.constant 0 : i32
    %c0_i32_1 = arith.constant 0 : i32
    return %c0_i32, %c0_i32_0 : i32, i32
  }
  func.func @transform_6(%arg0: i32) -> (i32, i32) {
    %c0_i32 = arith.constant 0 : i32
    %c0_i32_0 = arith.constant 0 : i32
    %c0_i32_1 = arith.constant 0 : i32
    return %c0_i32, %c0_i32_0 : i32, i32
  }
  func.func @transform_7(%arg0: i32) -> (i32, i32, i32) {
    %c0_i32 = arith.constant 0 : i32
    %c0_i32_0 = arith.constant 0 : i32
    %c0_i32_1 = arith.constant 0 : i32
    return %arg0, %c0_i32, %c0_i32_0 : i32, i32, i32
  }
}

</mosaic_0001>

<bundles_post_ra>
// kernel: basic_block_forward.1
= control target key start
LH: loop header
LB: loop body
LE: loop exit
PB: predicated region body
PF: predicated region fallthrough
CT: control target
= control target key end

     0   :  { %s942_s24 = smov 0   ;;  %s1228_s0 = inlined_call_operand.vmem [shape: f32[2,4,256], index: 0, kind: input, shape index: {}]   ;;  %s1229_s1 = inlined_call_operand.vmem [shape: f32[4,36], index: 1, kind: input, shape index: {}]   ;;  %s1230_s2 = inlined_call_operand.vmem [shape: f32[4,36], index: 2, kind: input, shape index: {}]   ;;  %s1231_s3 = inlined_call_operand.vmem [shape: f32[4,1], index: 3, kind: input, shape index: {}]   ;;  %s1232_s4 = inlined_call_operand.vmem [shape: f32[4,1], index: 4, kind: input, shape index: {}]   ;;  %s1233_s5 = inlined_call_operand.vmem [shape: f32[4,1], index: 5, kind: input, shape index: {}]   ;;  %s1234_s6 = inlined_call_operand.vmem [shape: f32[4,1], index: 6, kind: input, shape index: {}]   ;;  %s1235_s7 = inlined_call_operand.vmem [shape: f32[2,4,256], index: 7, kind: output, shape index: {}]  }
   0x1 LB: > { %s775_s25 = sadd.s32 4294967295, %s891_s24   ;;  %p779_p0 = scmp.ge.s32.totalorder %s891_s24, 1  ;;  %s891_s24 = sphi %s942_s24, %s17_s24  }
   0x2   : > { %p237_p1 = scmp.lt.s32.totalorder %s891_s24, 3 }
   0x4   : > { %p238_p2 = pnand %p779_p0, %p237_p1 }
   0x5   : > { %p269_p3 = scmp.lt.s32.totalorder (!%p238_p2), %s775_s25, 1  ;;  %s893_s30 = smov (!%p238_p2), 127  }
   0x6   : > { %241 = sbr.rel (%p238_p2) target bundleno = 626 (0x272), region = 48  ;;  %s894_s8 = smov (!%p238_p2), 1  }
   0x7   : > { %s895_s9 = smov (!%p238_p2), 113   ;;  %s896_s10 = smov (!%p238_p2), 112  }
   0x8   : > { %s897_s11 = smov (!%p238_p2), 17   ;;  %s898_s12 = smov (!%p238_p2), 111  }
   0x9   : > { %s899_s13 = smov (!%p238_p2), 15   ;;  %s900_s14 = smov (!%p238_p2), 16  }
   0xb   : > { %s1264_s25 = smov (!%p269_p3, %s775_s25), 1  ;;  %v280_v27 = vlaneseq  ;;  %v525_v29 = vld [vmem:[%s1231_s3] sm:$0xf]  ;;  %v901_v31 = vmov 0   ;;  %vm466_vm11 = vcmask 1043456  }
   0xc   : > { %s794_s26 = sshll.u32 %s1264_s25, 3  ;;  %v533_v30 = vld [vmem:[%s1232_s4] sm:$0xf]  ;;  %848 = vset.pattern.permute.xlu0 %v901_v31  ;;  %849 = vset.pattern.permute.xlu1 %v901_v31 }
   0xd   : > { %s273_s29 = scalar_lea.vmem %s1228_s0, %s794_s26  ;;  %v971_v28 = vand.u32 127, %v280_v27 }
   0xe   : > { %v279_v0 = vld [vmem:[%s273_s29] sm:$0xff] }
   0xf   : > { %325 = vst [vmem:[#allocation1] ss:$2 sm:$0xff] %v279_v0  ;;  %v980_v32 = vadd.s32 128, %v971_v28  ;;  %v287_v35 = vand.u32 15, %v971_v28  ;;  %vm418_vm0 = vcmp.lt.s32.totalorder %v971_v28, 112  ;;  %vm390_vm1 = vcmp.lt.s32.totalorder %v971_v28, 127 }
  0x10   : > { %vm1236_vm3 = vcmp.lt.s32.totalorder %v971_v28, 113  ;;  %vm1237_vm8 = vcmp.lt.s32.totalorder %v971_v28, 1  ;;  %vm432_vm9 = vcmp.lt.s32.totalorder %v971_v28, 111  ;;  %vm307_vm13 = vcmp.ge.s32.totalorder %v971_v28, 16 }
  0x11   : > { %v294_v36 = vand.u32 15, %v980_v32  ;;  %vm1238_vm2 = vcmp.lt.s32.totalorder %v980_v32, 240  ;;  %vm988_vm4 = vcmp.le.s32.totalorder %v287_v35, 14  ;;  %vm1002_vm7 = vcmp.ge.s32.totalorder %v287_v35, 1 }
  0x12   : > { %vm1239_vm14 = vcmp.lt.s32.totalorder %v971_v28, 17  ;;  %vm362_vm15 = vcmp.lt.s32.totalorder %v971_v28, 15 }
  0x13   : > { %vm992_vm5 = vcmp.ge.s32.totalorder %v294_v36, 1  ;;  %vm998_vm6 = vcmp.le.s32.totalorder %v294_v36, 14 }
  0x14   : > { %vm1022_vm10 = vmand %vm1238_vm2, %vm992_vm5 }
  0x15   : > { %vm1032_vm12 = vmand %vm1238_vm2, %vm998_vm6 }
  0x16   : > { %v326_v1 = vld.sshfl [vmem:[#allocation1] sm:$0xff pattern:$0x75316420]  ;;  %v327_v2 = vld.sshfl [vmem:[#allocation1 + $0x8] sm:$0xff pattern:$0x75316420] }
  0x17   : > { %339 = vst [vmem:[#allocation1] ss:$2 sm:$0xff] %v279_v0  ;;  %v843_v18 = vpack.i.bf16 %v327_v2, %v326_v1 }
  0x1e   : > { %v340_v3 = vld.sshfl [vmem:[#allocation1] sm:$0xff pattern:$0x75316420]  ;;  %v341_v4 = vld.sshfl [vmem:[#allocation1 + $0x8] sm:$0xff pattern:$0x75316420] }
  0x1f   : > { %353 = vst [vmem:[#allocation1] ss:$2 sm:$0xff] %v279_v0  ;;  %v833_v23 = vpack.i.bf16 %v341_v4, %v340_v3 }
  0x26   : > { %v354_v5 = vld.sshfl [vmem:[#allocation1] sm:$0xff pattern:$0x75316420]  ;;  %v355_v6 = vld.sshfl [vmem:[#allocation1 + $0x8] sm:$0xff pattern:$0x75316420] }
  0x27   : > { %367 = vst [vmem:[#allocation1] ss:$2 sm:$0xff] %v279_v0  ;;  %v838_v22 = vpack.i.bf16 %v355_v6, %v354_v5 }
  0x2e   : > { %v368_v7 = vld.sshfl [vmem:[#allocation1] sm:$0xff pattern:$0x75316420]  ;;  %v369_v8 = vld.sshfl [vmem:[#allocation1 + $0x8] sm:$0xff pattern:$0x75316420] }
  0x2f   : > { %381 = vst [vmem:[#allocation1] ss:$2 sm:$0xff] %v279_v0  ;;  %v813_v12 = vpack.i.bf16 %v369_v8, %v368_v7 }
  0x31   : > { %814 = vrot.lane.b32.xlu2 %v813_v12, %s894_s8 }
  0x36   : > { %v382_v9 = vld.sshfl [vmem:[#allocation1] sm:$0xff pattern:$0x75316420]  ;;  %v383_v10 = vld.sshfl [vmem:[#allocation1 + $0x8] sm:$0xff pattern:$0x75316420] }
  0x37   : > { %v818_v11 = vpack.i.bf16 %v383_v10, %v382_v9  ;;  %395 = vst [vmem:[#allocation1] ss:$2 sm:$0xff] %v279_v0 }
  0x39   : > { %819 = vrot.lane.b32.xlu1 %v818_v11, %s893_s30 }
  0x3e   : > { %v396_v13 = vld.sshfl [vmem:[#allocation1] sm:$0xff pattern:$0x75316420]  ;;  %v397_v14 = vld.sshfl [vmem:[#allocation1 + $0x8] sm:$0xff pattern:$0x75316420] }
  0x3f   : > { %409 = vst [vmem:[#allocation1] ss:$2 sm:$0xff] %v279_v0  ;;  %v823_v15 = vpack.i.bf16 %v397_v14, %v396_v13 }
  0x41   : > { %824 = vrot.lane.b32.xlu2 %v823_v15, %s895_s9 }
  0x46   : > { %v410_v16 = vld.sshfl [vmem:[#allocation1] sm:$0xff pattern:$0x75316420]  ;;  %v411_v17 = vld.sshfl [vmem:[#allocation1 + $0x8] sm:$0xff pattern:$0x75316420] }
  0x47   : > { %v828_v19 = vpack.i.bf16 %v411_v17, %v410_v16  ;;  %423 = vst [vmem:[#allocation1] ss:$2 sm:$0xff] %v279_v0 }
  0x49   : > { %829 = vrot.lane.b32.xlu0 %v828_v19, %s896_s10  ;;  %844 = vrot.lane.b32.xlu2 %v843_v18, %s897_s11 }
  0x4e   : > { %v425_v20 = vld.sshfl [vmem:[#allocation1 + $0x8] sm:$0xff pattern:$0x75316420]  ;;  %v424_v21 = vld.sshfl [vmem:[#allocation1] sm:$0xff pattern:$0x75316420] }
  0x4f   : > { %430 = vrot.lane.b32.xlu1 %v425_v20, %s898_s12  ;;  %449 = vst [vmem:[#allocation1] ss:$2 sm:$0xff] %v279_v0 }
  0x51   : > { %428 = vrot.lane.b32.xlu0 %v424_v21, %s898_s12 }
  0x56   : > { %v967_v24 = vld.sshfl [vmem:[#allocation1] sm:$0xff pattern:$0x75316420]  ;;  %v969_v25 = vld.sshfl [vmem:[#allocation1 + $0x8] sm:$0xff pattern:$0x75316420] }
  0x57   : > { %839 = vrot.lane.b32.xlu1 %v838_v22, %s899_s13  ;;  %705 = vst [vmem:[#allocation1] ss:$2 sm:$0xff] %v279_v0 }
  0x59   : > { %834 = vrot.lane.b32.xlu0 %v833_v23, %s900_s14 }
  0x5f   : > { %536 = vperm.xlu1 %849, %v533_v30  }
  0x61   : > { %528 = vperm.xlu0 %848, %v525_v29  }
  0x8b   : > { %v815_v26 = vpop.permute.xlu2 %814 }
  0x8c   : > { %v817_v44 = vunpack.i.h.bf16 %v815_v26  ;;  %v816_v45 = vunpack.i.l.bf16 %v815_v26 }
  0x8e   : > { %v378_v3 = vsel %vm1237_vm8, %v817_v44, %v816_v45  ;;  %v377_v7 = vsel %vm1237_vm8, %v816_v45, %v817_v44  ;;  %vm348_vm8 = vcmp.lt.s32.totalorder %v971_v28, 16 }
  0x8f   : > { %v379_v16 = vsel %vm1002_vm7, %v378_v3, 0.0  ;;  %v380_v17 = vsel %vm992_vm5, %v377_v7, 0.0  ;;  %v689_v3 = vld [vmem:[%s1233_s5] sm:$0xf] }
  0x90   : > { %v445_v27 = vrot.slane %v379_v16, 4 }
  0x9b   : > { %v825_v34 = vpop.permute.xlu2 %824 }
  0x9c   : > { %v827_v40 = vunpack.i.h.bf16 %v825_v34  ;;  %v826_v43 = vunpack.i.l.bf16 %v825_v34 }
  0x9e   : > { %v405_v53 = vsel %vm1236_vm3, %v826_v43, %v827_v40  ;;  %v406_v58 = vsel %vm1236_vm3, %v827_v40, %v826_v43  ;;  %vm1075_vm3 = vmand %vm307_vm13, %vm988_vm4 }
  0x9f   : > { %v407_v63 = vsel %vm1002_vm7, %v405_v53, 0.0  ;;  %v408_v6 = vsel %vm1022_vm10, %v406_v58, 0.0 }
  0xa3   : > { %v845_v2 = vpop.permute.xlu2 %844 }
  0xa4   : > { %v847_v12 = vunpack.i.h.bf16 %v845_v2  ;;  %v846_v13 = vunpack.i.l.bf16 %v845_v2 }
  0xa6   : > { %v336_v29 = vsel %vm1239_vm14, %v847_v12, %v846_v13 }
  0xab   : > { %v820_v33 = vpop.permute.xlu1 %819 }
  0xac   : > { %v822_v37 = vunpack.i.h.bf16 %v820_v33  ;;  %v821_v38 = vunpack.i.l.bf16 %v820_v33 }
  0xae   : > { %v391_v51 = vsel %vm390_vm1, %v821_v38, %v822_v37  ;;  %v392_v52 = vsel %vm390_vm1, %v822_v37, %v821_v38 }
  0xaf   : > { %v393_v60 = vsel %vm988_vm4, %v391_v51, 0.0  ;;  %v394_v61 = vsel %vm998_vm6, %v392_v52, 0.0  ;;  %v323_v51 = vld [vmem:[%s1229_s1] sm:$0xf] }
  0xb0   : > { %v456_v10 = vrot.slane %v393_v60, 4  ;;  %v457_v11 = vrot.slane %v394_v61, 4 }
  0xb2   : > { %v471_v19 = vsel %vm466_vm11, %v967_v24, %v456_v10  ;;  %v472_v20 = vsel %vm466_vm11, %v969_v25, %v457_v11  ;;  %v335_v24 = vsel %vm1239_vm14, %v846_v13, %v847_v12  ;;  %v446_v25 = vrot.slane %v380_v17, 4 }
  0xb3   : > { %v338_v38 = vsel %vm992_vm5, %v335_v24, 0.0  ;;  %vm475_vm14 = vcmask 293888  }
  0xbb   : > { %v830_v39 = vpop.permute.xlu0 %829 }
  0xbc   : > { %v832_v41 = vunpack.i.h.bf16 %v830_v39  ;;  %v831_v42 = vunpack.i.l.bf16 %v830_v39 }
  0xbe   : > { %v420_v48 = vsel %vm418_vm0, %v832_v41, %v831_v42  ;;  %v419_v54 = vsel %vm418_vm0, %v831_v42, %v832_v41 }
  0xbf   : > { %v422_v55 = vsel %vm1238_vm2, %v420_v48, 0.0  ;;  %v462_v0 = vrot.slane %v419_v54, 4  ;;  %vm1092_vm2 = vmand %vm307_vm13, %vm1002_vm7 }
  0xc0   : > { %v463_v1 = vrot.slane %v422_v55, 4  ;;  %v337_v44 = vsel %vm1092_vm2, %v336_v29, 0.0 }
  0xc1   : > { %v431_v56 = vpop.permute.xlu1 %430  ;;  %v473_v14 = vsel %vm466_vm11, %v407_v63, %v462_v0 }
  0xc2   : > { %v474_v15 = vsel %vm466_vm11, %v408_v6, %v463_v1 }
  0xc3   : > { %v429_v62 = vpop.permute.xlu0 %428 }
  0xc4   : > { %v433_v4 = vsel %vm432_vm9, %v429_v62, %v431_v56  ;;  %v434_v5 = vsel %vm432_vm9, %v431_v56, %v429_v62 }
  0xc5   : > { %v435_v8 = vsel %vm988_vm4, %v433_v4, 0.0  ;;  %v436_v9 = vsel %vm1032_vm12, %v434_v5, 0.0  ;;  %v697_v4 = vld [vmem:[%s1234_s6] sm:$0xf] }
  0xc6   : > { %784 = vmatpush.msk.msra.mxu0 %vm466_vm11, %v435_v8  ;;  %786 = vmatpush.msk.msra.mxu1 %vm466_vm11, %v436_v9 }
  0xc8   : > { %497 = vmatpush.msra.mxu0 %v473_v14  ;;  %517 = vmatpush.msra.mxu1 %v474_v15 }
  0xc9   : > { %v840_v18 = vpop.permute.xlu1 %839 }
  0xca   : > { %v842_v21 = vunpack.i.h.bf16 %v840_v18  ;;  %v841_v22 = vunpack.i.l.bf16 %v840_v18  ;;  %498 = vmatpush.msra.mxu0 %v471_v19  ;;  %518 = vmatpush.msra.mxu1 %v472_v20 }
  0xcb   : > { %v835_v26 = vpop.permute.xlu0 %834 }
  0xcc   : > { %v837_v30 = vunpack.i.h.bf16 %v835_v26  ;;  %v836_v31 = vunpack.i.l.bf16 %v835_v26  ;;  %v364_v33 = vsel %vm362_vm15, %v842_v21, %v841_v22  ;;  %v363_v34 = vsel %vm362_vm15, %v841_v22, %v842_v21 }
  0xcd   : > { %v365_v36 = vsel %vm1075_vm3, %v364_v33, 0.0  ;;  %v366_v37 = vsel %vm998_vm6, %v363_v34, 0.0 }
  0xce   : > { %v469_v39 = vsel %vm466_vm11, %v365_v36, %v445_v27  ;;  %v470_v40 = vsel %vm466_vm11, %v366_v37, %v446_v25  ;;  %v349_v41 = vsel %vm348_vm8, %v836_v31, %v837_v30  ;;  %v350_v42 = vsel %vm348_vm8, %v837_v30, %v836_v31 }
  0xcf   : > { %499 = vmatpush.msra.mxu0 %v469_v39  ;;  %519 = vmatpush.msra.mxu1 %v470_v40  ;;  %v440_v43 = vrot.slane %v349_v41, 4  ;;  %v351_v45 = vsel %vm307_vm13, %v350_v42, 0.0 }
  0xd0   : > { %v439_v48 = vrot.slane %v351_v45, 4 }
  0xd1   : > { %v468_v52 = vsel %vm466_vm11, %v338_v38, %v440_v43  ;;  %v537_v56 = vpop.permute.xlu1 %536 }
  0xd2   : > { %520 = vmatpush.msra.mxu1 %v468_v52  ;;  %v467_v53 = vsel %vm466_vm11, %v337_v44, %v439_v48 }
  0xd3   : > { %500 = vmatpush.msra.mxu0 %v467_v53  ;;  %787 = vmatmul.msk.f32.vlgmr.msra.gmra.mxu1 %vm475_vm14, %v323_v51  ;;  %v529_v54 = vpop.permute.xlu0 %528 }
  0xd4   : > { %785 = vmatmul.msk.f32.vlgmr.msra.gmra.mxu0 %vm475_vm14, %v323_v51 }
 0x150   : > { %v522_v55 = vpop.f32.mrf.mxu1 }
 0x151   : > { %v502_v58 = vpop.f32.mrf.mxu0  ;;  %v532_v60 = vmul.f32 %v529_v54, %v522_v55 }
 0x152   : > { %v531_v61 = vmul.f32 %v529_v54, %v502_v58 }
 0x153   : > { %v540_v62 = vadd.f32 %v537_v56, %v532_v60 }
 0x154   : > { %v539_v63 = vadd.f32 %v537_v56, %v531_v61 }
 0x155   : > { %v1119_v0 = vmax.f32 %v540_v62, 0.0 }
 0x156   : > { %v1121_v1 = vmax.f32 %v539_v63, 0.0 }
 0x158   : > { %600 = vrot.lane.b32.xlu1 %v1121_v1, %s898_s12  ;;  %v855_v2 = vpack.i.bf16 %v1119_v0, %v1121_v1 }
 0x15a   : > { %856 = vrot.lane.b32.xlu0 %v855_v2, %s893_s30  ;;  %851 = vrot.lane.b32.xlu2 %v855_v2, %s896_s10 }
 0x160   : > { %861 = vrot.lane.b32.xlu1 %v855_v2, %s895_s9  ;;  %s278_s9 = scalar_lea.vmem %s1235_s7, %s794_s26 }
 0x162   : > { %871 = vrot.lane.b32.xlu0 %v855_v2, %s899_s13  ;;  %602 = vrot.lane.b32.xlu2 %v1119_v0, %s898_s12 }
 0x168   : > { %876 = vrot.lane.b32.xlu1 %v855_v2, %s900_s14 }
 0x16a   : > { %692 = vperm.xlu0 %848, %v689_v3   ;;  %866 = vrot.lane.b32.xlu2 %v855_v2, %s894_s8 }
 0x170   : > { %700 = vperm.xlu1 %849, %v697_v4  }
 0x172   : > { %881 = vrot.lane.b32.xlu2 %v855_v2, %s897_s11 }
 0x1b4   : > { %v852_v5 = vpop.permute.xlu2 %851 }
 0x1b5   : > { %v854_v7 = vunpack.i.h.bf16 %v852_v5  ;;  %v853_v8 = vunpack.i.l.bf16 %v852_v5 }
 0x1b7   : > { %v597_v18 = vsel %vm418_vm0, %v854_v7, %v853_v8  ;;  %v596_v59 = vsel %vm418_vm0, %v853_v8, %v854_v7  ;;  %vm1259_vm0 = vcmp.lt.s32.totalorder %v971_v28, 113 }
 0x1b8   : > { %v628_v36 = vrot.slane %v596_v59, 4 }
 0x1bc   : > { %v603_v6 = vpop.permute.xlu2 %602 }
 0x1c4   : > { %v867_v10 = vpop.permute.xlu2 %866 }
 0x1c5   : > { %v869_v19 = vunpack.i.h.bf16 %v867_v10  ;;  %v868_v20 = vunpack.i.l.bf16 %v867_v10  ;;  %v543_v10 = vld [vmem:[%s1230_s2] sm:$0xf] }
 0x1ca   : > { %v601_v9 = vpop.permute.xlu1 %600 }
 0x1cb   : > { %v604_v11 = vsel %vm432_vm9, %v601_v9, %v603_v6  ;;  %v605_v12 = vsel %vm432_vm9, %v603_v6, %v601_v9  ;;  %vm1256_vm9 = vcmp.lt.s32.totalorder %v980_v32, 240 }
 0x1cc   : > { %v857_v13 = vpop.permute.xlu0 %856  ;;  %v606_v14 = vsel %vm988_vm4, %v604_v11, 0.0  ;;  %v607_v15 = vsel %vm1032_vm12, %v605_v12, 0.0  ;;  %v599_v24 = vsel %vm1256_vm9, %v597_v18, 0.0  ;;  %vm1257_vm12 = vcmp.lt.s32.totalorder %v971_v28, 1  ;;  %v882_v39 = vpop.permute.xlu2 %881 }
 0x1cd   : > { %v859_v16 = vunpack.i.h.bf16 %v857_v13  ;;  %v858_v17 = vunpack.i.l.bf16 %v857_v13  ;;  %788 = vmatpush.msk.msra.mxu2 %vm466_vm11, %v606_v14  ;;  %790 = vmatpush.msk.msra.mxu3 %vm466_vm11, %v607_v15  ;;  %v573_v31 = vsel %vm1257_vm12, %v869_v19, %v868_v20  ;;  %v629_v37 = vrot.slane %v599_v24, 4 }
 0x1ce   : > { %v574_v45 = vsel %vm1002_vm7, %v573_v31, 0.0  ;;  %v884_v55 = vunpack.i.h.bf16 %v882_v39  ;;  %v883_v56 = vunpack.i.l.bf16 %v882_v39 }
 0x1cf   : > { %v580_v21 = vsel %vm390_vm1, %v858_v17, %v859_v16  ;;  %v581_v22 = vsel %vm390_vm1, %v859_v16, %v858_v17  ;;  %vm1258_vm1 = vmmov %vm1257_vm12  ;;  %v616_v61 = vrot.slane %v574_v45, 4  ;;  %v707_v17 = vld.sshfl [vmem:[#allocation1 + $0x8] sm:$0xff pattern:$0x75316420] }
 0x1d0   : > { %v582_v26 = vsel %vm988_vm4, %v580_v21, 0.0  ;;  %v583_v27 = vsel %vm998_vm6, %v581_v22, 0.0  ;;  %v572_v33 = vsel %vm1258_vm1, %v868_v20, %v869_v19  ;;  %vm1260_vm4 = vmmov %vm1259_vm0  ;;  %v706_v20 = vld.sshfl [vmem:[#allocation1] sm:$0xff pattern:$0x75316420] }
 0x1d1   : > { %v622_v32 = vrot.slane %v582_v26, 4  ;;  %v623_v38 = vrot.slane %v583_v27, 4  ;;  %v575_v48 = vsel %vm992_vm5, %v572_v33, 0.0 }
 0x1d2   : > { %v862_v25 = vpop.permute.xlu1 %861  ;;  %v617_v62 = vrot.slane %v575_v48, 4 }
 0x1d3   : > { %v864_v29 = vunpack.i.h.bf16 %v862_v25  ;;  %v863_v30 = vunpack.i.l.bf16 %v862_v25  ;;  %v636_v58 = vsel %vm466_vm11, %v1121_v1, %v622_v32  ;;  %v637_v60 = vsel %vm466_vm11, %v1119_v0, %v623_v38 }
 0x1d4   : > { %v872_v34 = vpop.permute.xlu0 %871 }
 0x1d5   : > { %v874_v46 = vunpack.i.h.bf16 %v872_v34  ;;  %v873_v40 = vunpack.i.l.bf16 %v872_v34  ;;  %v588_v41 = vsel %vm1259_vm0, %v863_v30, %v864_v29  ;;  %v589_v42 = vsel %vm1260_vm4, %v864_v29, %v863_v30 }
 0x1d6   : > { %v590_v43 = vsel %vm1002_vm7, %v588_v41, 0.0  ;;  %v591_v44 = vsel %vm1022_vm10, %v589_v42, 0.0 }
 0x1d7   : > { %v638_v51 = vsel %vm466_vm11, %v590_v43, %v628_v36  ;;  %v639_v52 = vsel %vm466_vm11, %v591_v44, %v629_v37  ;;  %v565_v53 = vsel %vm362_vm15, %v874_v46, %v873_v40  ;;  %v564_v54 = vsel %vm362_vm15, %v873_v40, %v874_v46 }
 0x1d8   : > { %661 = vmatpush.msra.mxu2 %v638_v51  ;;  %681 = vmatpush.msra.mxu3 %v639_v52  ;;  %v566_v50 = vsel %vm1075_vm3, %v565_v53, 0.0  ;;  %v567_v57 = vsel %vm998_vm6, %v564_v54, 0.0  ;;  %vm1261_vm3 = vcmp.lt.s32.totalorder %v971_v28, 17 }
 0x1d9   : > { %v634_v4 = vsel %vm466_vm11, %v566_v50, %v616_v61  ;;  %v635_v23 = vsel %vm466_vm11, %v567_v57, %v617_v62  ;;  %v548_v49 = vsel %vm1261_vm3, %v883_v56, %v884_v55  ;;  %vm1262_vm6 = vmmov %vm1261_vm3 }
 0x1da   : > { %v877_v63 = vpop.permute.xlu1 %876  ;;  %662 = vmatpush.msra.mxu2 %v636_v58  ;;  %682 = vmatpush.msra.mxu3 %v637_v60  ;;  %v549_v0 = vsel %vm1262_vm6, %v884_v55, %v883_v56  ;;  %v551_v8 = vsel %vm992_vm5, %v548_v49, 0.0 }
 0x1db   : > { %v879_v2 = vunpack.i.h.bf16 %v877_v63  ;;  %v878_v3 = vunpack.i.l.bf16 %v877_v63  ;;  %v550_v12 = vsel %vm1092_vm2, %v549_v0, 0.0 }
 0x1dc   : > { %663 = vmatpush.msra.mxu2 %v634_v4  ;;  %683 = vmatpush.msra.mxu3 %v635_v23  ;;  %v693_v28 = vpop.permute.xlu0 %692 }
 0x1dd   : > { %v556_v1 = vsel %vm348_vm8, %v878_v3, %v879_v2  ;;  %v557_v5 = vsel %vm348_vm8, %v879_v2, %v878_v3 }
 0x1de   : > { %v611_v6 = vrot.slane %v556_v1, 4  ;;  %v558_v7 = vsel %vm307_vm13, %v557_v5, 0.0 }
 0x1df   : > { %v610_v9 = vrot.slane %v558_v7, 4 }
 0x1e0   : > { %v633_v11 = vsel %vm466_vm11, %v551_v8, %v611_v6 }
 0x1e1   : > { %684 = vmatpush.msra.mxu3 %v633_v11  ;;  %v632_v13 = vsel %vm466_vm11, %v550_v12, %v610_v9 }
 0x1e2   : > { %664 = vmatpush.msra.mxu2 %v632_v13  ;;  %791 = vmatmul.msk.f32.vlgmr.msra.gmra.mxu3 %vm475_vm14, %v543_v10  ;;  %v701_v16 = vpop.permute.xlu1 %700 }
 0x1e3   : > { %789 = vmatmul.msk.f32.vlgmr.msra.gmra.mxu2 %vm475_vm14, %v543_v10 }
 0x265   : > { %v686_v47 = vpop.f32.mrf.mxu3 }
 0x266   : > { %v696_v14 = vmul.f32 %v693_v28, %v686_v47  ;;  %v666_v15 = vpop.f32.mrf.mxu2 }
 0x267   : > { %v695_v18 = vmul.f32 %v693_v28, %v666_v15 }
 0x268   : > { %v704_v19 = vadd.f32 %v701_v16, %v696_v14 }
 0x269   : > { %v703_v35 = vadd.f32 %v701_v16, %v695_v18 }
 0x26a   : > { %v711_v21 = vadd.f32 %v707_v17, %v704_v19 }
 0x26b   : > { %v710_v22 = vadd.f32 %v706_v20, %v703_v35 }
 0x26c   : > { %v713_v59 = vmax.f32 %v711_v21, 0.0 }
 0x26d   : > { %v712_v24 = vmax.f32 %v710_v22, 0.0 }
 0x26e   : > { %v716_v26 = vrot.slane %v713_v59, 4 }
 0x270   : > { %v717_v27 = vsel %vm466_vm11, %v712_v24, %v716_v26 }
 0x271   : > { %719 = vst [vmem:[%s278_s9] sm:$0xff] %v717_v27 }
 0x272 PF: > { %s17_s24 = sadd.s32 1, %s891_s24  }
 0x273   : > { %p14_p4 = scmp.ge.s32.totalorder %s17_s24, 4  }
 0x275   :  { %16 = sbr.rel (!%p14_p4) target bundleno = 1 (0x1), region = 78 }

</bundles_post_ra>
